<compile_context>
chip_gen: v6e
topology: v6e:2x2x1
jax: 0.10.0
libtpu: 0.0.40
codegen_flags: <defaults>
</compile_context>

<pallas_src>
import math

import jax
import jax.numpy as jnp
from jax.experimental import pallas as pl
from jax.experimental.pallas import tpu as pltpu

# ------------------------------ configuration -------------------------------
B = 2
C = 48            # CAB in_channels (divisible by 6 -> mid channels = 8)
H = W = 16
CMID = C // 6


# ------------------------------ Pallas kernel --------------------------------
def _cab_fused_kernel(x1_ref, x2_ref, w1a_ref, w1b_ref, b1_ref,
                      w2_ref, b2_ref, o_ref):
    """One batch element per grid step.

    x1_ref, x2_ref, o_ref : [1, C, HW]  (C on sublanes, HW on lanes)
    w1a_ref, w1b_ref      : [CMID, C]   (conv1_1 weight split over [x1 | x2])
    b1_ref                : [CMID, 1]
    w2_ref                : [C, CMID]
    b2_ref                : [C, 1]
    """
    x1 = x1_ref[0]                                           # [C, HW]
    x2 = x2_ref[0]                                           # [C, HW]
    inv_hw = 1.0 / x1.shape[-1]

    # AdaptiveAvgPool2d(1) of cat([x1, x2], dim=1) == per-input spatial means.
    p1 = jnp.sum(x1, axis=-1, keepdims=True) * inv_hw        # [C, 1]
    p2 = jnp.sum(x2, axis=-1, keepdims=True) * inv_hw        # [C, 1]

    # conv1_1 (1x1) on the pooled vector, weight pre-split so no concat:
    #   mid = W1 @ [p1; p2] + b1 = W1a @ p1 + W1b @ p2 + b1
    mid = (jnp.dot(w1a_ref[...], p1, preferred_element_type=jnp.float32)
           + jnp.dot(w1b_ref[...], p2, preferred_element_type=jnp.float32)
           + b1_ref[...])
    mid = jnp.maximum(mid, 0.0)                              # ReLU, [CMID, 1]

    # conv1_2 (1x1) + sigmoid -> per-channel gate.
    gate = jnp.dot(w2_ref[...], mid, preferred_element_type=jnp.float32)
    gate = jax.nn.sigmoid(gate + b2_ref[...])                # [C, 1]

    # Fused epilogue: gate broadcast over the lane (spatial) axis.
    o_ref[0] = gate * x1 + x2


def cab_forward(params, x1, x2):
    """CAB forward.  x1, x2: [B, C, H, W] NCHW, like the PyTorch module."""
    Bn, Cn, Hn, Wn = x1.shape
    HW = Hn * Wn
    x1f = x1.reshape(Bn, Cn, HW)          # free reshape, no transpose
    x2f = x2.reshape(Bn, Cn, HW)

    w1, b1 = params["w1"], params["b1"]   # [CMID, 2C], [CMID]
    w2, b2 = params["w2"], params["b2"]   # [C, CMID],  [C]
    cmid = w1.shape[0]
    w1a, w1b = w1[:, :Cn], w1[:, Cn:]

    out = pl.pallas_call(
        _cab_fused_kernel,
        out_shape=jax.ShapeDtypeStruct((Bn, Cn, HW), jnp.float32),
        grid=(Bn,),
        in_specs=[
            pl.BlockSpec((1, Cn, HW), lambda b: (b, 0, 0)),
            pl.BlockSpec((1, Cn, HW), lambda b: (b, 0, 0)),
            pl.BlockSpec((cmid, Cn), lambda b: (0, 0)),
            pl.BlockSpec((cmid, Cn), lambda b: (0, 0)),
            pl.BlockSpec((cmid, 1), lambda b: (0, 0)),
            pl.BlockSpec((Cn, cmid), lambda b: (0, 0)),
            pl.BlockSpec((Cn, 1), lambda b: (0, 0)),
        ],
        out_specs=pl.BlockSpec((1, Cn, HW), lambda b: (b, 0, 0)),
        compiler_params=pltpu.CompilerParams(
            dimension_semantics=("parallel",)),
    )(x1f, x2f, w1a, w1b, b1.reshape(cmid, 1), w2, b2.reshape(Cn, 1))
    return out.reshape(Bn, Cn, Hn, Wn)


# ---------------------------- params & reference -----------------------------
def init_cab_params(key, c):
    """PyTorch Conv2d default init (uniform +-1/sqrt(fan_in)), 1x1 kernels."""
    cmid = c // 6
    k1w, k1b, k2w, k2b = jax.random.split(key, 4)
    bound1 = 1.0 / math.sqrt(2 * c)       # conv1_1 fan-in = 2C
    bound2 = 1.0 / math.sqrt(cmid)        # conv1_2 fan-in = CMID
    return {
        "w1": jax.random.uniform(k1w, (cmid, 2 * c), jnp.float32, -bound1, bound1),
        "b1": jax.random.uniform(k1b, (cmid,), jnp.float32, -bound1, bound1),
        "w2": jax.random.uniform(k2w, (c, cmid), jnp.float32, -bound2, bound2),
        "b2": jax.random.uniform(k2b, (c,), jnp.float32, -bound2, bound2),
    }


def cab_reference(params, x1, x2):
    """Pure-JAX reference mirroring the PyTorch CAB.forward."""
    xc = jnp.concatenate([x1, x2], axis=1)                   # [B, 2C, H, W]
    xp = jnp.mean(xc, axis=(2, 3))                           # [B, 2C]
    mid = jnp.maximum(xp @ params["w1"].T + params["b1"], 0.0)
    gate = jax.nn.sigmoid(mid @ params["w2"].T + params["b2"])  # [B, C]
    return gate[:, :, None, None] * x1 + x2


# ----------------------------------- main ------------------------------------
if __name__ == "__main__":
    key = jax.random.PRNGKey(0)
    kx1, kx2, kp = jax.random.split(key, 3)
    x1 = jax.random.normal(kx1, (B, C, H, W), jnp.float32)
    x2 = jax.random.normal(kx2, (B, C, H, W), jnp.float32)
    params = init_cab_params(kp, C)

    fwd = jax.jit(lambda a, b: cab_forward(params, a, b))
    out = jax.block_until_ready(fwd(x1, x2))

    assert out.shape == (B, C, H, W), out.shape
    assert bool(jnp.all(jnp.isfinite(out)))

    ref = cab_reference(params, x1, x2)
    max_err = float(jnp.max(jnp.abs(out - ref)))
    assert max_err < 1e-4, f"max abs err vs reference: {max_err}"

    print("KERNEL_OK")
</pallas_src>

<mosaic_0001>
module attributes {stable_mosaic.version = 11 : i64} {
  func.func @_cab_fused_kernel(%arg0: i32, %arg1: memref<1x48x256xf32, #tpu.memory_space<vmem>>, %arg2: memref<1x48x256xf32, #tpu.memory_space<vmem>>, %arg3: memref<8x48xf32, #tpu.memory_space<vmem>>, %arg4: memref<8x48xf32, #tpu.memory_space<vmem>>, %arg5: memref<8x1xf32, #tpu.memory_space<vmem>>, %arg6: memref<48x8xf32, #tpu.memory_space<vmem>>, %arg7: memref<48x1xf32, #tpu.memory_space<vmem>>, %arg8: memref<1x48x256xf32, #tpu.memory_space<vmem>>) attributes {dimension_semantics = [#tpu.dimension_semantics<parallel>], iteration_bounds = array<i64: 2>, scalar_prefetch = 0 : i64, scratch_operands = 0 : i64, tpu.core_type = #tpu.core_type<tc>, window_params = [{transform_indices = @transform_0, window_bounds = array<i64: 1, 48, 256>}, {transform_indices = @transform_1, window_bounds = array<i64: 1, 48, 256>}, {pipeline_mode = #tpu.pipeline_mode<synchronous>, transform_indices = @transform_2, window_bounds = array<i64: 8, 48>}, {pipeline_mode = #tpu.pipeline_mode<synchronous>, transform_indices = @transform_3, window_bounds = array<i64: 8, 48>}, {pipeline_mode = #tpu.pipeline_mode<synchronous>, transform_indices = @transform_4, window_bounds = array<i64: 8, 1>}, {pipeline_mode = #tpu.pipeline_mode<synchronous>, transform_indices = @transform_5, window_bounds = array<i64: 48, 8>}, {pipeline_mode = #tpu.pipeline_mode<synchronous>, transform_indices = @transform_6, window_bounds = array<i64: 48, 1>}, {transform_indices = @transform_7, window_bounds = array<i64: 1, 48, 256>}]} {
    %c0 = arith.constant 0 : index
    %c0_0 = arith.constant 0 : index
    %c0_1 = arith.constant 0 : index
    %0 = vector.load %arg1[%c0, %c0_0, %c0_1] : memref<1x48x256xf32, #tpu.memory_space<vmem>>, vector<1x48x256xf32>
    %1 = vector.shape_cast %0 : vector<1x48x256xf32> to vector<48x256xf32>
    %c0_2 = arith.constant 0 : index
    %c0_3 = arith.constant 0 : index
    %c0_4 = arith.constant 0 : index
    %2 = vector.load %arg2[%c0_2, %c0_3, %c0_4] : memref<1x48x256xf32, #tpu.memory_space<vmem>>, vector<1x48x256xf32>
    %3 = vector.shape_cast %2 : vector<1x48x256xf32> to vector<48x256xf32>
    %cst = arith.constant dense<0.000000e+00> : vector<48xf32>
    %4 = vector.multi_reduction <add>, %1, %cst [1] : vector<48x256xf32> to vector<48xf32>
    %5 = vector.shape_cast %4 : vector<48xf32> to vector<48x1xf32>
    %cst_5 = arith.constant 3.906250e-03 : f32
    %6 = vector.broadcast %cst_5 : f32 to vector<48x1xf32>
    %7 = arith.mulf %5, %6 : vector<48x1xf32>
    %cst_6 = arith.constant dense<0.000000e+00> : vector<48xf32>
    %8 = vector.multi_reduction <add>, %3, %cst_6 [1] : vector<48x256xf32> to vector<48xf32>
    %9 = vector.shape_cast %8 : vector<48xf32> to vector<48x1xf32>
    %cst_7 = arith.constant 3.906250e-03 : f32
    %10 = vector.broadcast %cst_7 : f32 to vector<48x1xf32>
    %11 = arith.mulf %9, %10 : vector<48x1xf32>
    %c0_8 = arith.constant 0 : index
    %c0_9 = arith.constant 0 : index
    %12 = vector.load %arg3[%c0_8, %c0_9] : memref<8x48xf32, #tpu.memory_space<vmem>>, vector<8x48xf32>
    %cst_10 = arith.constant dense<0.000000e+00> : vector<8x1xf32>
    %13 = tpu.matmul %12, %7, %cst_10 {dimension_numbers = #tpu.dot_dimension_numbers<[1], [0], [0], [1], [0, 0, 1, 1], [], []>} : vector<8x48xf32>, vector<48x1xf32>, vector<8x1xf32> -> vector<8x1xf32>
    %c0_11 = arith.constant 0 : index
    %c0_12 = arith.constant 0 : index
    %14 = vector.load %arg4[%c0_11, %c0_12] : memref<8x48xf32, #tpu.memory_space<vmem>>, vector<8x48xf32>
    %cst_13 = arith.constant dense<0.000000e+00> : vector<8x1xf32>
    %15 = tpu.matmul %14, %11, %cst_13 {dimension_numbers = #tpu.dot_dimension_numbers<[1], [0], [0], [1], [0, 0, 1, 1], [], []>} : vector<8x48xf32>, vector<48x1xf32>, vector<8x1xf32> -> vector<8x1xf32>
    %16 = arith.addf %13, %15 : vector<8x1xf32>
    %c0_14 = arith.constant 0 : index
    %c0_15 = arith.constant 0 : index
    %17 = vector.load %arg5[%c0_14, %c0_15] : memref<8x1xf32, #tpu.memory_space<vmem>>, vector<8x1xf32>
    %18 = arith.addf %16, %17 : vector<8x1xf32>
    %cst_16 = arith.constant 0.000000e+00 : f32
    %19 = vector.broadcast %cst_16 : f32 to vector<8x1xf32>
    %20 = arith.maximumf %18, %19 : vector<8x1xf32>
    %c0_17 = arith.constant 0 : index
    %c0_18 = arith.constant 0 : index
    %21 = vector.load %arg6[%c0_17, %c0_18] : memref<48x8xf32, #tpu.memory_space<vmem>>, vector<48x8xf32>
    %cst_19 = arith.constant dense<0.000000e+00> : vector<48x1xf32>
    %22 = tpu.matmul %21, %20, %cst_19 {dimension_numbers = #tpu.dot_dimension_numbers<[1], [0], [0], [1], [0, 0, 1, 1], [], []>} : vector<48x8xf32>, vector<8x1xf32>, vector<48x1xf32> -> vector<48x1xf32>
    %c0_20 = arith.constant 0 : index
    %c0_21 = arith.constant 0 : index
    %23 = vector.load %arg7[%c0_20, %c0_21] : memref<48x1xf32, #tpu.memory_space<vmem>>, vector<48x1xf32>
    %24 = arith.addf %22, %23 : vector<48x1xf32>
    %25 = arith.negf %24 : vector<48x1xf32>
    %26 = math.exp %25 : vector<48x1xf32>
    %cst_22 = arith.constant 1.000000e+00 : f32
    %27 = vector.broadcast %cst_22 : f32 to vector<48x1xf32>
    %28 = arith.addf %27, %26 : vector<48x1xf32>
    %29 = arith.divf %27, %28 : vector<48x1xf32>
    %30 = vector.broadcast %29 : vector<48x1xf32> to vector<48x256xf32>
    %31 = arith.mulf %30, %1 : vector<48x256xf32>
    %32 = arith.addf %31, %3 : vector<48x256xf32>
    %c0_23 = arith.constant 0 : index
    %c0_24 = arith.constant 0 : index
    %c0_25 = arith.constant 0 : index
    %33 = vector.load %arg8[%c0_23, %c0_24, %c0_25] : memref<1x48x256xf32, #tpu.memory_space<vmem>>, vector<1x48x256xf32>
    %34 = vector.shape_cast %33 : vector<1x48x256xf32> to vector<48x256xf32>
    %35 = vector.shape_cast %32 : vector<48x256xf32> to vector<1x48x256xf32>
    tpu.vector_store %arg8[%c0_23, %c0_24, %c0_25], %35 {strides = array<i32>} : memref<1x48x256xf32, #tpu.memory_space<vmem>>, vector<1x48x256xf32>,
    return
  }
  func.func @transform_0(%arg0: i32) -> (i32, i32, i32) {
    %c0_i32 = arith.constant 0 : i32
    %c0_i32_0 = arith.constant 0 : i32
    %c0_i32_1 = arith.constant 0 : i32
    return %arg0, %c0_i32, %c0_i32_0 : i32, i32, i32
  }
  func.func @transform_1(%arg0: i32) -> (i32, i32, i32) {
    %c0_i32 = arith.constant 0 : i32
    %c0_i32_0 = arith.constant 0 : i32
    %c0_i32_1 = arith.constant 0 : i32
    return %arg0, %c0_i32, %c0_i32_0 : i32, i32, i32
  }
  func.func @transform_2(%arg0: i32) -> (i32, i32) {
    %c0_i32 = arith.constant 0 : i32
    %c0_i32_0 = arith.constant 0 : i32
    %c0_i32_1 = arith.constant 0 : i32
    return %c0_i32, %c0_i32_0 : i32, i32
  }
  func.func @transform_3(%arg0: i32) -> (i32, i32) {
    %c0_i32 = arith.constant 0 : i32
    %c0_i32_0 = arith.constant 0 : i32
    %c0_i32_1 = arith.constant 0 : i32
    return %c0_i32, %c0_i32_0 : i32, i32
  }
  func.func @transform_4(%arg0: i32) -> (i32, i32) {
    %c0_i32 = arith.constant 0 : i32
    %c0_i32_0 = arith.constant 0 : i32
    %c0_i32_1 = arith.constant 0 : i32
    return %c0_i32, %c0_i32_0 : i32, i32
  }
  func.func @transform_5(%arg0: i32) -> (i32, i32) {
    %c0_i32 = arith.constant 0 : i32
    %c0_i32_0 = arith.constant 0 : i32
    %c0_i32_1 = arith.constant 0 : i32
    return %c0_i32, %c0_i32_0 : i32, i32
  }
  func.func @transform_6(%arg0: i32) -> (i32, i32) {
    %c0_i32 = arith.constant 0 : i32
    %c0_i32_0 = arith.constant 0 : i32
    %c0_i32_1 = arith.constant 0 : i32
    return %c0_i32, %c0_i32_0 : i32, i32
  }
  func.func @transform_7(%arg0: i32) -> (i32, i32, i32) {
    %c0_i32 = arith.constant 0 : i32
    %c0_i32_0 = arith.constant 0 : i32
    %c0_i32_1 = arith.constant 0 : i32
    return %arg0, %c0_i32, %c0_i32_0 : i32, i32, i32
  }
}

</mosaic_0001>

<bundles_post_ra>
// kernel: _lambda_.1
= control target key start
LH: loop header
LB: loop body
LE: loop exit
PB: predicated region body
PF: predicated region fallthrough
CT: control target
= control target key end

     0   :  { %s995_s24 = smov 0   ;;  %s1209_s0 = inlined_call_operand.vmem [shape: f32[2,48,256], index: 0, kind: input, shape index: {}]   ;;  %s1210_s1 = inlined_call_operand.vmem [shape: f32[2,48,256], index: 1, kind: input, shape index: {}]   ;;  %s1211_s2 = inlined_call_operand.vmem [shape: f32[8,48], index: 2, kind: input, shape index: {}]   ;;  %s1212_s3 = inlined_call_operand.vmem [shape: f32[8,48], index: 3, kind: input, shape index: {}]   ;;  %s1213_s4 = inlined_call_operand.vmem [shape: f32[8,1], index: 4, kind: input, shape index: {}]   ;;  %s1214_s5 = inlined_call_operand.vmem [shape: f32[48,8], index: 5, kind: input, shape index: {}]   ;;  %s1215_s6 = inlined_call_operand.vmem [shape: f32[48,1], index: 6, kind: input, shape index: {}]   ;;  %s1216_s7 = inlined_call_operand.vmem [shape: f32[2,48,256], index: 7, kind: output, shape index: {}]  }
   0x1 LB: > { %s818_s25 = sadd.s32 4294967295, %s950_s24   ;;  %p822_p0 = scmp.ge.s32.totalorder %s950_s24, 1  ;;  %s950_s24 = sphi %s995_s24, %s17_s24  }
   0x2   : > { %p247_p1 = scmp.lt.s32.totalorder %s950_s24, 3 }
   0x4   : > { %p248_p2 = pnand %p822_p0, %p247_p1 }
   0x5   : > { %p284_p3 = scmp.lt.s32.totalorder (!%p248_p2), %s818_s25, 1 }
   0x6   : > { %251 = sbr.rel (%p248_p2) target bundleno = 753 (0x2f1), region = 48 }
   0xb   : > { %s1218_s25 = smov (!%p284_p3, %s818_s25), 1  ;;  %v952_v29 = vmov 0.0   ;;  %vm953_vm0 = vmmov 0   ;;  %vm373_vm1 = vcmask 392192   ;;  %v371_v60 = vld [vmem:[%s1211_s2] sm:$0xff]  ;;  %vm535_vm2 = vcmask 64512  }
   0xc   : > { %s1003_s26 = smul.u32 96, %s1218_s25  ;;  %878 = vmatprep.subr.mxu1 %v952_v29  ;;  %863 = vmatprep.subr.mxu0 %v952_v29  ;;  %v372_v62 = vld [vmem:[%s1212_s3] sm:$0xff] }
   0xd   : > { %875 = vmatprep.mubr.msk.f32.mxu0 %vm953_vm0, %v952_v29  ;;  %890 = vmatprep.mubr.msk.f32.mxu1 %vm953_vm0, %v952_v29  ;;  %v523_v63 = vld [vmem:[%s1214_s5] sm:$0xff] }
   0xe   : > { %s1009_s29 = scalar_lea.vmem %s1209_s0, %s1003_s26  ;;  %s1015_s9 = scalar_lea.vmem %s1210_s1, %s1003_s26 }
   0xf   : > { %v1018_v0 = vld [vmem:[%s1009_s29 + $0x50] sm:$0xff]  ;;  %v1021_v1 = vld [vmem:[%s1009_s29 + $0x58] sm:$0xff]  ;;  %v1024_v2 = vld [vmem:[%s1009_s29 + $0x40] sm:$0xff]  ;;  %s1170_s21 = scalar_lea.vmem %s1216_s7, %s1003_s26 }
  0x10   : > { %v338_v3 = vadd.f32 %v1021_v1, %v1018_v0  ;;  %v1029_v4 = vld [vmem:[%s1009_s29 + $0x48] sm:$0xff]  ;;  %v1032_v5 = vld [vmem:[%s1015_s9 + $0x50] sm:$0xff]  ;;  %v1035_v6 = vld [vmem:[%s1015_s9 + $0x58] sm:$0xff] }
  0x11   : > { %v335_v7 = vadd.f32 %v1029_v4, %v1024_v2  ;;  %v1040_v8 = vld [vmem:[%s1015_s9 + $0x40] sm:$0xff]  ;;  %v1043_v9 = vld [vmem:[%s1015_s9 + $0x48] sm:$0xff]  ;;  %v362_v10 = vadd.f32 %v1035_v6, %v1032_v5  ;;  %v1050_v12 = vld [vmem:[%s1009_s29 + $0x30] sm:$0xff] }
  0x12   : > { %339 = vadd.xlane.f32.xlu0 %v338_v3  ;;  %v359_v11 = vadd.f32 %v1043_v9, %v1040_v8  ;;  %v1053_v13 = vld [vmem:[%s1009_s29 + $0x38] sm:$0xff]  ;;  %v1056_v14 = vld [vmem:[%s1015_s9 + $0x30] sm:$0xff]  ;;  %v1066_v18 = vld [vmem:[%s1009_s29 + $0x20] sm:$0xff] }
  0x13   : > { %336 = vadd.xlane.f32.xlu1 %v335_v7  ;;  %v1059_v15 = vld [vmem:[%s1015_s9 + $0x38] sm:$0xff]  ;;  %v332_v16 = vadd.f32 %v1053_v13, %v1050_v12  ;;  %v1069_v19 = vld [vmem:[%s1009_s29 + $0x28] sm:$0xff]  ;;  %v1072_v20 = vld [vmem:[%s1015_s9 + $0x20] sm:$0xff] }
  0x14   : > { %v356_v17 = vadd.f32 %v1059_v15, %v1056_v14  ;;  %v1075_v21 = vld [vmem:[%s1015_s9 + $0x28] sm:$0xff]  ;;  %v329_v22 = vadd.f32 %v1069_v19, %v1066_v18  ;;  %v1082_v24 = vld [vmem:[%s1009_s29 + $0x10] sm:$0xff]  ;;  %v1085_v25 = vld [vmem:[%s1009_s29 + $0x18] sm:$0xff] }
  0x15   : > { %v353_v23 = vadd.f32 %v1075_v21, %v1072_v20  ;;  %v1088_v26 = vld [vmem:[%s1015_s9 + $0x10] sm:$0xff]  ;;  %v1091_v27 = vld [vmem:[%s1015_s9 + $0x18] sm:$0xff]  ;;  %v326_v28 = vadd.f32 %v1085_v25, %v1082_v24  ;;  %v1098_v31 = vld [vmem:[%s1009_s29] sm:$0xff] }
  0x16   : > { %363 = vadd.xlane.f32.xlu0 %v362_v10  ;;  %v350_v30 = vadd.f32 %v1091_v27, %v1088_v26  ;;  %v1101_v32 = vld [vmem:[%s1009_s29 + $0x8] sm:$0xff]  ;;  %v1104_v33 = vld [vmem:[%s1015_s9] sm:$0xff]  ;;  %v525_v3 = vld [vmem:[%s1214_s5 + $0x10] sm:$0xff] }
  0x17   : > { %360 = vadd.xlane.f32.xlu1 %v359_v11  ;;  %v1107_v34 = vld [vmem:[%s1015_s9 + $0x8] sm:$0xff]  ;;  %v323_v35 = vadd.f32 %v1101_v32, %v1098_v31  ;;  %v520_v11 = vld [vmem:[%s1213_s4] sm:$0xff] }
  0x18   : > { %v347_v36 = vadd.f32 %v1107_v34, %v1104_v33 }
  0x1a   : > { %333 = vadd.xlane.f32.xlu0 %v332_v16 }
  0x1b   : > { %357 = vadd.xlane.f32.xlu1 %v356_v17 }
  0x1e   : > { %330 = vadd.xlane.f32.xlu0 %v329_v22 }
  0x1f   : > { %354 = vadd.xlane.f32.xlu1 %v353_v23 }
  0x22   : > { %327 = vadd.xlane.f32.xlu0 %v326_v28 }
  0x23   : > { %351 = vadd.xlane.f32.xlu1 %v350_v30  ;;  %v526_v30 = vld [vmem:[%s1214_s5 + $0x18] sm:$0xff] }
  0x26   : > { %324 = vadd.xlane.f32.xlu0 %v323_v35  ;;  %v527_v35 = vld [vmem:[%s1214_s5 + $0x20] sm:$0xff] }
  0x27   : > { %348 = vadd.xlane.f32.xlu1 %v347_v36  ;;  %v528_v36 = vld [vmem:[%s1214_s5 + $0x28] sm:$0xff] }
  0x9b   : > { %v340_v37 = vpop.xlane.xlu0 %339 }
  0x9c   : > { %v346_v38 = vmul.f32 0.00390625, %v340_v37  ;;  %v337_v39 = vpop.xlane.xlu1 %336  ;;  %v954_v37 = vmov 0  }
  0x9d   : > { %v345_v40 = vmul.f32 0.00390625, %v337_v39  ;;  %919 = vset.pattern.permute.xlu1 %v954_v37  ;;  %918 = vset.pattern.permute.xlu0 %v954_v37  ;;  %v532_v39 = vld [vmem:[%s1215_s6 + $0x18] sm:$0xff] }
  0x9e   : > { %879 = vmatpush3.msra.mxu1 %v346_v38  ;;  %v530_v38 = vld [vmem:[%s1215_s6 + $0x8] sm:$0xff] }
  0x9f   : > { %880 = vmatprep.subr.mxu1 %v952_v29  ;;  %v364_v41 = vpop.xlane.xlu0 %363 }
  0xa0   : > { %v370_v42 = vmul.f32 0.00390625, %v364_v41  ;;  %v361_v43 = vpop.xlane.xlu1 %360  ;;  %881 = vmatpush3.msra.mxu1 %v345_v40  ;;  %v529_v41 = vld [vmem:[%s1215_s6] sm:$0xff] }
  0xa1   : > { %882 = vmatprep.subr.mxu1 %v952_v29  ;;  %v369_v44 = vmul.f32 0.00390625, %v361_v43  ;;  %v531_v43 = vld [vmem:[%s1215_s6 + $0x10] sm:$0xff] }
  0xa2   : > { %864 = vmatpush3.msra.mxu0 %v370_v42 }
  0xa3   : > { %865 = vmatprep.subr.mxu0 %v952_v29  ;;  %v334_v45 = vpop.xlane.xlu0 %333 }
  0xa4   : > { %v358_v46 = vpop.xlane.xlu1 %357  ;;  %v344_v47 = vmul.f32 0.00390625, %v334_v45  ;;  %866 = vmatpush3.msra.mxu0 %v369_v44 }
  0xa5   : > { %v368_v48 = vmul.f32 0.00390625, %v358_v46  ;;  %867 = vmatprep.subr.mxu0 %v952_v29 }
  0xa6   : > { %883 = vmatpush3.msra.mxu1 %v344_v47 }
  0xa7   : > { %868 = vmatpush3.msra.mxu0 %v368_v48  ;;  %v331_v49 = vpop.xlane.xlu0 %330  ;;  %884 = vmatprep.subr.mxu1 %v952_v29 }
  0xa8   : > { %v355_v50 = vpop.xlane.xlu1 %354  ;;  %v343_v51 = vmul.f32 0.00390625, %v331_v49  ;;  %869 = vmatprep.subr.mxu0 %v952_v29 }
  0xa9   : > { %v367_v52 = vmul.f32 0.00390625, %v355_v50 }
  0xaa   : > { %885 = vmatpush3.msra.mxu1 %v343_v51 }
  0xab   : > { %870 = vmatpush3.msra.mxu0 %v367_v52  ;;  %v328_v53 = vpop.xlane.xlu0 %327  ;;  %886 = vmatprep.subr.mxu1 %v952_v29 }
  0xac   : > { %v352_v54 = vpop.xlane.xlu1 %351  ;;  %v342_v55 = vmul.f32 0.00390625, %v328_v53  ;;  %871 = vmatprep.subr.mxu0 %v952_v29  ;;  %v533_v53 = vld [vmem:[%s1215_s6 + $0x20] sm:$0xff] }
  0xad   : > { %v366_v56 = vmul.f32 0.00390625, %v352_v54 }
  0xae   : > { %887 = vmatpush3.msra.mxu1 %v342_v55 }
  0xaf   : > { %872 = vmatpush3.msra.mxu0 %v366_v56  ;;  %v325_v57 = vpop.xlane.xlu0 %324  ;;  %888 = vmatprep.subr.mxu1 %v952_v29  ;;  %v534_v56 = vld [vmem:[%s1215_s6 + $0x28] sm:$0xff] }
  0xb0   : > { %v349_v58 = vpop.xlane.xlu1 %348  ;;  %v341_v59 = vmul.f32 0.00390625, %v325_v57  ;;  %873 = vmatprep.subr.mxu0 %v952_v29  ;;  %v524_v29 = vld [vmem:[%s1214_s5 + $0x8] sm:$0xff] }
  0xb1   : > { %v365_v61 = vmul.f32 0.00390625, %v349_v58 }
  0xb2   : > { %889 = vmatpush3.msra.mxu1 %v341_v59 }
  0xb3   : > { %874 = vmatpush3.msra.mxu0 %v365_v61  ;;  %891 = vmatmul.mubr.msk.f32.vlgmr.msra.gmra.mxu1 %vm373_vm1, %v371_v60 }
  0xb4   : > { %876 = vmatmul.mubr.msk.f32.vlgmr.msra.gmra.mxu0 %vm373_vm1, %v372_v62  ;;  %898 = vmatprep.mubr.msk.f32.mxu1 %vm535_vm2, %v525_v3 }
  0xb5   : > { %895 = vmatprep.mubr.msk.f32.mxu0 %vm535_vm2, %v523_v63 }
 0x173   : > { %v516_v7 = vpop.f32.mrf.mxu1 }
 0x174   : > { %v443_v10 = vpop.f32.mrf.mxu0 }
 0x175   : > { %v517_v16 = vadd.f32 %v516_v7, %v443_v10  ;;  %v892_v17 = vpop.f32.mrf.mxu1 }
 0x176   : > { %v877_v22 = vpop.f32.mrf.mxu0 }
 0x177   : > { %v521_v23 = vadd.f32 %v520_v11, %v517_v16 }
 0x179   : > { %v522_v28 = vmax.f32 %v521_v23, 0.0 }
 0x17b   : > { %893 = vmatprep.subr.mxu0 %v522_v28  ;;  %904 = vmatprep.subr.mxu1 %v522_v28 }
 0x17c   : > { %894 = vmatpush3.msra.mxu0 %v522_v28  ;;  %905 = vmatpush3.msra.mxu1 %v522_v28 }
 0x17d   : > { %896 = vmatmul.mubr.msk.f32.vlgmr.msra.gmra.mxu0 %vm535_vm2, %v524_v29  ;;  %899 = vmatmul.mubr.msk.f32.vlgmr.msra.gmra.mxu1 %vm535_vm2, %v526_v30 }
 0x17e   : > { %901 = vmatprep.mubr.msk.f32.mxu1 %vm535_vm2, %v527_v35 }
 0x181   : > { %902 = vmatmul.mubr.msk.f32.gmra.mxu1 %vm535_vm2, %v528_v36 }
 0x23d   : > { %v897_v40 = vpop.f32.mrf.mxu0  ;;  %v900_v42 = vpop.f32.mrf.mxu1 }
 0x23e   : > { %v626_v44 = vadd.f32 %v897_v40, %v530_v38  ;;  %v636_v45 = vadd.f32 %v900_v42, %v532_v39 }
 0x23f   : > { %v620_v46 = vpop.f32.mrf.mxu0  ;;  %v630_v47 = vpop.f32.mrf.mxu1 }
 0x240   : > { %v835_v48 = vmul.f32 -1.442695, %v626_v44  ;;  %v621_v49 = vadd.f32 %v620_v46, %v529_v41  ;;  %v837_v50 = vmul.f32 -1.442695, %v636_v45  ;;  %v631_v51 = vadd.f32 %v630_v47, %v531_v43 }
 0x241   : > { %v903_v52 = vpop.f32.mrf.mxu1 }
 0x242   : > { %920 = vpow2.f32 %v835_v48  ;;  %v834_v54 = vmul.f32 -1.442695, %v621_v49  ;;  %v836_v55 = vmul.f32 -1.442695, %v631_v51  ;;  %v646_v59 = vadd.f32 %v903_v52, %v534_v56 }
 0x243   : > { %922 = vpow2.f32 %v837_v50  ;;  %v640_v57 = vpop.f32.mrf.mxu1 }
 0x244   : > { %924 = vpow2.f32 %v834_v54  ;;  %v641_v58 = vadd.f32 %v640_v57, %v533_v53  ;;  %v839_v61 = vmul.f32 -1.442695, %v646_v59 }
 0x245   : > { %926 = vpow2.f32 %v836_v55 }
 0x246   : > { %v838_v60 = vmul.f32 -1.442695, %v641_v58 }
 0x248   : > { %928 = vpow2.f32 %v838_v60 }
 0x249   : > { %930 = vpow2.f32 %v839_v61 }
 0x24f   : > { %v921_v62 = vpop.eup %920 }
 0x250   : > { %v923_v63 = vpop.eup %922  ;;  %v668_v3 = vadd.f32 1.0, %v921_v62 }
 0x251   : > { %v925_v7 = vpop.eup %924  ;;  %v670_v10 = vadd.f32 1.0, %v923_v63 }
 0x252   : > { %932 = vrcp.f32 %v668_v3  ;;  %v667_v11 = vadd.f32 1.0, %v925_v7  ;;  %v927_v16 = vpop.eup %926 }
 0x253   : > { %934 = vrcp.f32 %v670_v10  ;;  %v669_v17 = vadd.f32 1.0, %v927_v16 }
 0x254   : > { %936 = vrcp.f32 %v667_v11 }
 0x255   : > { %v929_v22 = vpop.eup %928  ;;  %938 = vrcp.f32 %v669_v17 }
 0x256   : > { %v671_v23 = vadd.f32 1.0, %v929_v22  ;;  %v931_v28 = vpop.eup %930 }
 0x257   : > { %v672_v29 = vadd.f32 1.0, %v931_v28 }
 0x258   : > { %940 = vrcp.f32 %v671_v23 }
 0x259   : > { %942 = vrcp.f32 %v672_v29 }
 0x25f   : > { %v933_v30 = vpop.eup %932 }
 0x260   : > { %v935_v35 = vpop.eup %934  ;;  %692 = vperm.xlu1 %919, %v933_v30  }
 0x261   : > { %v937_v36 = vpop.eup %936 }
 0x262   : > { %687 = vperm.xlu0 %918, %v937_v36   ;;  %v939_v37 = vpop.eup %938 }
 0x264   : > { %702 = vperm.xlu1 %919, %v935_v35  }
 0x265   : > { %v941_v38 = vpop.eup %940 }
 0x266   : > { %v943_v39 = vpop.eup %942 }
 0x268   : > { %697 = vperm.xlu1 %919, %v939_v37  }
 0x26c   : > { %707 = vperm.xlu1 %919, %v941_v38  }
 0x270   : > { %712 = vperm.xlu1 %919, %v943_v39  }
 0x2db   : > { %v693_v40 = vpop.permute.xlu1 %692 }
 0x2dc   : > { %v717_v41 = vmul.f32 %v693_v40, %v1082_v24  ;;  %v718_v42 = vmul.f32 %v693_v40, %v1085_v25 }
 0x2dd   : > { %v688_v43 = vpop.permute.xlu0 %687 }
 0x2de   : > { %v729_v44 = vadd.f32 %v717_v41, %v1088_v26  ;;  %v730_v45 = vadd.f32 %v718_v42, %v1091_v27  ;;  %v715_v24 = vmul.f32 %v688_v43, %v1098_v31  ;;  %v716_v25 = vmul.f32 %v688_v43, %v1101_v32 }
 0x2df   : > { %v703_v46 = vpop.permute.xlu1 %702 }
 0x2e0   : > { %741 = vst [vmem:[%s1170_s21 + $0x10] sm:$0xff] %v729_v44  ;;  %742 = vst [vmem:[%s1170_s21 + $0x18] sm:$0xff] %v730_v45  ;;  %v727_v47 = vadd.f32 %v715_v24, %v1104_v33  ;;  %v728_v48 = vadd.f32 %v716_v25, %v1107_v34  ;;  %v721_v49 = vmul.f32 %v703_v46, %v1050_v12 }
 0x2e1   : > { %v722_v26 = vmul.f32 %v703_v46, %v1053_v13 }
 0x2e2   : > { %739 = vst [vmem:[%s1170_s21] sm:$0xff] %v727_v47  ;;  %740 = vst [vmem:[%s1170_s21 + $0x8] sm:$0xff] %v728_v48  ;;  %v733_v27 = vadd.f32 %v721_v49, %v1056_v14 }
 0x2e3   : > { %v734_v31 = vadd.f32 %v722_v26, %v1059_v15  ;;  %v698_v32 = vpop.permute.xlu1 %697 }
 0x2e4   : > { %745 = vst [vmem:[%s1170_s21 + $0x30] sm:$0xff] %v733_v27  ;;  %v719_v33 = vmul.f32 %v698_v32, %v1066_v18  ;;  %v720_v34 = vmul.f32 %v698_v32, %v1069_v19 }
 0x2e5   : > { %746 = vst [vmem:[%s1170_s21 + $0x38] sm:$0xff] %v734_v31 }
 0x2e6   : > { %v731_v50 = vadd.f32 %v719_v33, %v1072_v20  ;;  %v732_v12 = vadd.f32 %v720_v34, %v1075_v21 }
 0x2e7   : > { %v708_v13 = vpop.permute.xlu1 %707 }
 0x2e8   : > { %743 = vst [vmem:[%s1170_s21 + $0x20] sm:$0xff] %v731_v50  ;;  %744 = vst [vmem:[%s1170_s21 + $0x28] sm:$0xff] %v732_v12  ;;  %v723_v14 = vmul.f32 %v708_v13, %v1024_v2  ;;  %v724_v15 = vmul.f32 %v708_v13, %v1029_v4 }
 0x2ea   : > { %v735_v51 = vadd.f32 %v723_v14, %v1040_v8  ;;  %v736_v52 = vadd.f32 %v724_v15, %v1043_v9 }
 0x2eb   : > { %v713_v18 = vpop.permute.xlu1 %712 }
 0x2ec   : > { %747 = vst [vmem:[%s1170_s21 + $0x40] sm:$0xff] %v735_v51  ;;  %748 = vst [vmem:[%s1170_s21 + $0x48] sm:$0xff] %v736_v52  ;;  %v725_v19 = vmul.f32 %v713_v18, %v1018_v0  ;;  %v726_v20 = vmul.f32 %v713_v18, %v1021_v1 }
 0x2ee   : > { %v737_v21 = vadd.f32 %v725_v19, %v1032_v5  ;;  %v738_v53 = vadd.f32 %v726_v20, %v1035_v6 }
 0x2f0   : > { %749 = vst [vmem:[%s1170_s21 + $0x50] sm:$0xff] %v737_v21  ;;  %750 = vst [vmem:[%s1170_s21 + $0x58] sm:$0xff] %v738_v53 }
 0x2f1 PF: > { %s17_s24 = sadd.s32 1, %s950_s24  }
 0x2f2   : > { %p14_p4 = scmp.ge.s32.totalorder %s17_s24, 4  }
 0x2f4   :  { %16 = sbr.rel (!%p14_p4) target bundleno = 1 (0x1), region = 81 }

</bundles_post_ra>
